<compile_context>
chip_gen: v5e
topology: v5e:2x2
jax: 0.10.0
libtpu: 0.0.40
codegen_flags: <defaults>
</compile_context>

<pallas_src>
import functools

import jax
import jax.numpy as jnp
from jax.experimental import pallas as pl
from jax.experimental.pallas import tpu as pltpu


def _conv_bn_kernel(x_ref, w_ref, g_ref, b_ref, o_ref, *, eps, training):
    # x_ref: (N, Cin, S)   all batch elements, spatial flattened on the lane axis
    # w_ref: (Cout, Cin)   1x1 conv weight
    # g_ref: (Cout, 1)     gamma (training) or folded scale (eval)
    # b_ref: (Cout, 1)     beta  (training) or folded bias  (eval)
    # o_ref: (N, Cout, S)  pre-upsample conv+BN result (S multiple of 128 -> lane-dense)
    n, cin, _s = x_ref.shape
    s = x_ref.shape[2]

    w = w_ref[...].astype(jnp.float32)                    # (Cout, Cin)

    # 1x1 conv as an unrolled VPU outer-product FMA (Cin/Cout tiny -> MXU not worth it).
    ys = []
    for i in range(n):                                    # N small & static -> unrolled
        x = x_ref[i].astype(jnp.float32)                  # (Cin, S), cast in-kernel
        acc = w[:, 0:1] * x[0:1, :]                       # (Cout,1)*(1,S) -> (Cout,S)
        for k in range(1, cin):
            acc = acc + w[:, k:k + 1] * x[k:k + 1, :]
        ys.append(acc)

    if training:
        # Batch-statistics BatchNorm (PyTorch default training-mode forward).  Nearest x2
        # upsampling replicates each element 4x, so mean/var over the upsampled tensor equal
        # those over the pre-upsample conv output -> exact to compute them here.
        count = float(n * s)
        ssum = ys[0].sum(axis=-1, keepdims=True)
        for i in range(1, n):
            ssum = ssum + ys[i].sum(axis=-1, keepdims=True)
        mean = ssum / count                               # (Cout, 1)
        ssq = jnp.zeros_like(mean)
        for i in range(n):
            d = ys[i] - mean
            ssq = ssq + (d * d).sum(axis=-1, keepdims=True)
        var = ssq / count                                 # biased, as PyTorch normalizes with
        scale = g_ref[...].astype(jnp.float32) * jax.lax.rsqrt(var + eps)
        bias = b_ref[...].astype(jnp.float32) - mean * scale
    else:
        # Eval mode: running stats already folded into scale/bias in the wrapper.
        scale = g_ref[...].astype(jnp.float32)
        bias = b_ref[...].astype(jnp.float32)

    for i in range(n):
        o_ref[i] = (ys[i] * scale + bias).astype(o_ref.dtype)


def upsampling_forward(x_nchw, conv_w, gamma, beta, running_mean, running_var,
                       eps=1e-5, training=True):
    """x_nchw: (N, Cin, H, W).  conv_w: (Cout, Cin).  Returns (N, Cout, 2H, 2W)."""
    N, Cin, H, W = x_nchw.shape
    Cout = conv_w.shape[0]
    S = H * W

    # Free row-major reshape: NCHW -> (N, Cin, H*W).  Native dtype (cast happens in-kernel).
    x_flat = x_nchw.reshape(N, Cin, S)

    if training:
        g = gamma.astype(jnp.float32)[:, None]
        b = beta.astype(jnp.float32)[:, None]
    else:
        scale = gamma / jnp.sqrt(running_var + eps)
        g = scale.astype(jnp.float32)[:, None]
        b = (beta - running_mean * scale).astype(jnp.float32)[:, None]

    kernel = functools.partial(_conv_bn_kernel, eps=float(eps),
                               training=bool(training))

    y_flat = pl.pallas_call(
        kernel,
        out_shape=jax.ShapeDtypeStruct((N, Cout, S), x_nchw.dtype),
        grid_spec=pltpu.PrefetchScalarGridSpec(
            num_scalar_prefetch=0,
            grid=(1,),  # single step: whole (tiny) problem in one tile, N unrolled in-kernel
            in_specs=[
                pl.BlockSpec((N, Cin, S), lambda i: (0, 0, 0)),
                pl.BlockSpec((Cout, Cin), lambda i: (0, 0)),
                pl.BlockSpec((Cout, 1), lambda i: (0, 0)),
                pl.BlockSpec((Cout, 1), lambda i: (0, 0)),
            ],
            out_specs=pl.BlockSpec((N, Cout, S), lambda i: (0, 0, 0)),
        ),
        compiler_params=pltpu.CompilerParams(
            dimension_semantics=("arbitrary",)),
    )(x_flat, conv_w.astype(jnp.float32), g, b)

    # Nearest-neighbor x2 upsample: single fused expand+broadcast+reshape (exactly one read of
    # the small result and one write of the final tensor).
    y = y_flat.reshape(N, Cout, H, W)
    return jnp.broadcast_to(
        y[:, :, :, None, :, None], (N, Cout, H, 2, W, 2)
    ).reshape(N, Cout, 2 * H, 2 * W)


def upsampling_reference(x_nchw, conv_w, gamma, beta, running_mean, running_var,
                         eps=1e-5, training=True):
    """Pure-JAX reference matching the PyTorch module forward."""
    # nearest x2 upsample on NCHW
    x_up = jnp.repeat(jnp.repeat(x_nchw, 2, axis=2), 2, axis=3)
    # 1x1 conv, no bias
    y = jnp.einsum('nchw,oc->nohw', x_up, conv_w)
    # BatchNorm2d
    if training:
        mean = jnp.mean(y, axis=(0, 2, 3))
        var = jnp.var(y, axis=(0, 2, 3))          # biased, as used for normalization
    else:
        mean, var = running_mean, running_var
    scale = gamma / jnp.sqrt(var + eps)
    bias = beta - mean * scale
    return y * scale[None, :, None, None] + bias[None, :, None, None]


if __name__ == "__main__":
    key = jax.random.PRNGKey(0)
    k_x, k_w, k_g, k_b, k_m, k_v = jax.random.split(key, 6)

    N, Cin, H, W = 2, 4, 16, 16
    Cout = 8

    x = jax.random.normal(k_x, (N, Cin, H, W), dtype=jnp.float32)
    conv_w = jax.random.normal(k_w, (Cout, Cin), dtype=jnp.float32) * 0.1
    gamma = 1.0 + 0.1 * jax.random.normal(k_g, (Cout,), dtype=jnp.float32)
    beta = 0.1 * jax.random.normal(k_b, (Cout,), dtype=jnp.float32)
    running_mean = 0.1 * jax.random.normal(k_m, (Cout,), dtype=jnp.float32)
    running_var = jnp.abs(1.0 + 0.1 * jax.random.normal(k_v, (Cout,),
                                                        dtype=jnp.float32))

    # Training mode (PyTorch default): batch statistics computed inside the kernel.
    out_tr = upsampling_forward(x, conv_w, gamma, beta, running_mean, running_var,
                                training=True)
    out_tr = jax.block_until_ready(out_tr)
    ref_tr = upsampling_reference(x, conv_w, gamma, beta, running_mean, running_var,
                                  training=True)
    assert out_tr.shape == (N, Cout, 2 * H, 2 * W), out_tr.shape
    assert jnp.allclose(out_tr, ref_tr, atol=1e-4, rtol=1e-4), \
        float(jnp.max(jnp.abs(out_tr - ref_tr)))

    # Eval mode: running stats folded into the affine in the wrapper.
    out_ev = upsampling_forward(x, conv_w, gamma, beta, running_mean, running_var,
                                training=False)
    out_ev = jax.block_until_ready(out_ev)
    ref_ev = upsampling_reference(x, conv_w, gamma, beta, running_mean, running_var,
                                  training=False)
    assert jnp.allclose(out_ev, ref_ev, atol=1e-4, rtol=1e-4), \
        float(jnp.max(jnp.abs(out_ev - ref_ev)))

    print("KERNEL_OK")
</pallas_src>

<mosaic_0001>
module attributes {stable_mosaic.version = 11 : i64} {
  func.func @_conv_bn_kernel(%arg0: i32, %arg1: memref<2x4x256xf32, #tpu.memory_space<vmem>>, %arg2: memref<8x4xf32, #tpu.memory_space<vmem>>, %arg3: memref<8x1xf32, #tpu.memory_space<vmem>>, %arg4: memref<8x1xf32, #tpu.memory_space<vmem>>, %arg5: memref<2x8x256xf32, #tpu.memory_space<vmem>>) attributes {dimension_semantics = [#tpu.dimension_semantics<arbitrary>], iteration_bounds = array<i64: 1>, scalar_prefetch = 0 : i64, scratch_operands = 0 : i64, tpu.core_type = #tpu.core_type<tc>, window_params = [{pipeline_mode = #tpu.pipeline_mode<synchronous>, transform_indices = @transform_0, window_bounds = array<i64: 2, 4, 256>}, {pipeline_mode = #tpu.pipeline_mode<synchronous>, transform_indices = @transform_1, window_bounds = array<i64: 8, 4>}, {pipeline_mode = #tpu.pipeline_mode<synchronous>, transform_indices = @transform_2, window_bounds = array<i64: 8, 1>}, {pipeline_mode = #tpu.pipeline_mode<synchronous>, transform_indices = @transform_3, window_bounds = array<i64: 8, 1>}, {pipeline_mode = #tpu.pipeline_mode<synchronous>, transform_indices = @transform_4, window_bounds = array<i64: 2, 8, 256>}]} {
    %c0 = arith.constant 0 : index
    %c0_0 = arith.constant 0 : index
    %0 = vector.load %arg2[%c0, %c0_0] : memref<8x4xf32, #tpu.memory_space<vmem>>, vector<8x4xf32>
    %c0_1 = arith.constant 0 : index
    %c0_2 = arith.constant 0 : index
    %c0_3 = arith.constant 0 : index
    %1 = vector.load %arg1[%c0_1, %c0_2, %c0_3] : memref<2x4x256xf32, #tpu.memory_space<vmem>>, vector<1x4x256xf32>
    %2 = vector.shape_cast %1 : vector<1x4x256xf32> to vector<4x256xf32>
    %3 = vector.extract_strided_slice %0 {offsets = [0, 0], sizes = [8, 1], strides = [1, 1]} : vector<8x4xf32> to vector<8x1xf32>
    %4 = vector.extract_strided_slice %2 {offsets = [0, 0], sizes = [1, 256], strides = [1, 1]} : vector<4x256xf32> to vector<1x256xf32>
    %5 = vector.broadcast %3 : vector<8x1xf32> to vector<8x256xf32>
    %6 = vector.broadcast %4 : vector<1x256xf32> to vector<8x256xf32>
    %7 = arith.mulf %5, %6 : vector<8x256xf32>
    %8 = vector.extract_strided_slice %0 {offsets = [0, 1], sizes = [8, 1], strides = [1, 1]} : vector<8x4xf32> to vector<8x1xf32>
    %9 = vector.extract_strided_slice %2 {offsets = [1, 0], sizes = [1, 256], strides = [1, 1]} : vector<4x256xf32> to vector<1x256xf32>
    %10 = vector.broadcast %8 : vector<8x1xf32> to vector<8x256xf32>
    %11 = vector.broadcast %9 : vector<1x256xf32> to vector<8x256xf32>
    %12 = arith.mulf %10, %11 : vector<8x256xf32>
    %13 = arith.addf %7, %12 : vector<8x256xf32>
    %14 = vector.extract_strided_slice %0 {offsets = [0, 2], sizes = [8, 1], strides = [1, 1]} : vector<8x4xf32> to vector<8x1xf32>
    %15 = vector.extract_strided_slice %2 {offsets = [2, 0], sizes = [1, 256], strides = [1, 1]} : vector<4x256xf32> to vector<1x256xf32>
    %16 = vector.broadcast %14 : vector<8x1xf32> to vector<8x256xf32>
    %17 = vector.broadcast %15 : vector<1x256xf32> to vector<8x256xf32>
    %18 = arith.mulf %16, %17 : vector<8x256xf32>
    %19 = arith.addf %13, %18 : vector<8x256xf32>
    %20 = vector.extract_strided_slice %0 {offsets = [0, 3], sizes = [8, 1], strides = [1, 1]} : vector<8x4xf32> to vector<8x1xf32>
    %21 = vector.extract_strided_slice %2 {offsets = [3, 0], sizes = [1, 256], strides = [1, 1]} : vector<4x256xf32> to vector<1x256xf32>
    %22 = vector.broadcast %20 : vector<8x1xf32> to vector<8x256xf32>
    %23 = vector.broadcast %21 : vector<1x256xf32> to vector<8x256xf32>
    %24 = arith.mulf %22, %23 : vector<8x256xf32>
    %25 = arith.addf %19, %24 : vector<8x256xf32>
    %c1 = arith.constant 1 : index
    %c0_4 = arith.constant 0 : index
    %c0_5 = arith.constant 0 : index
    %26 = vector.load %arg1[%c1, %c0_4, %c0_5] : memref<2x4x256xf32, #tpu.memory_space<vmem>>, vector<1x4x256xf32>
    %27 = vector.shape_cast %26 : vector<1x4x256xf32> to vector<4x256xf32>
    %28 = vector.extract_strided_slice %0 {offsets = [0, 0], sizes = [8, 1], strides = [1, 1]} : vector<8x4xf32> to vector<8x1xf32>
    %29 = vector.extract_strided_slice %27 {offsets = [0, 0], sizes = [1, 256], strides = [1, 1]} : vector<4x256xf32> to vector<1x256xf32>
    %30 = vector.broadcast %28 : vector<8x1xf32> to vector<8x256xf32>
    %31 = vector.broadcast %29 : vector<1x256xf32> to vector<8x256xf32>
    %32 = arith.mulf %30, %31 : vector<8x256xf32>
    %33 = vector.extract_strided_slice %0 {offsets = [0, 1], sizes = [8, 1], strides = [1, 1]} : vector<8x4xf32> to vector<8x1xf32>
    %34 = vector.extract_strided_slice %27 {offsets = [1, 0], sizes = [1, 256], strides = [1, 1]} : vector<4x256xf32> to vector<1x256xf32>
    %35 = vector.broadcast %33 : vector<8x1xf32> to vector<8x256xf32>
    %36 = vector.broadcast %34 : vector<1x256xf32> to vector<8x256xf32>
    %37 = arith.mulf %35, %36 : vector<8x256xf32>
    %38 = arith.addf %32, %37 : vector<8x256xf32>
    %39 = vector.extract_strided_slice %0 {offsets = [0, 2], sizes = [8, 1], strides = [1, 1]} : vector<8x4xf32> to vector<8x1xf32>
    %40 = vector.extract_strided_slice %27 {offsets = [2, 0], sizes = [1, 256], strides = [1, 1]} : vector<4x256xf32> to vector<1x256xf32>
    %41 = vector.broadcast %39 : vector<8x1xf32> to vector<8x256xf32>
    %42 = vector.broadcast %40 : vector<1x256xf32> to vector<8x256xf32>
    %43 = arith.mulf %41, %42 : vector<8x256xf32>
    %44 = arith.addf %38, %43 : vector<8x256xf32>
    %45 = vector.extract_strided_slice %0 {offsets = [0, 3], sizes = [8, 1], strides = [1, 1]} : vector<8x4xf32> to vector<8x1xf32>
    %46 = vector.extract_strided_slice %27 {offsets = [3, 0], sizes = [1, 256], strides = [1, 1]} : vector<4x256xf32> to vector<1x256xf32>
    %47 = vector.broadcast %45 : vector<8x1xf32> to vector<8x256xf32>
    %48 = vector.broadcast %46 : vector<1x256xf32> to vector<8x256xf32>
    %49 = arith.mulf %47, %48 : vector<8x256xf32>
    %50 = arith.addf %44, %49 : vector<8x256xf32>
    %cst = arith.constant dense<0.000000e+00> : vector<8xf32>
    %51 = vector.multi_reduction <add>, %25, %cst [1] : vector<8x256xf32> to vector<8xf32>
    %52 = vector.shape_cast %51 : vector<8xf32> to vector<8x1xf32>
    %cst_6 = arith.constant dense<0.000000e+00> : vector<8xf32>
    %53 = vector.multi_reduction <add>, %50, %cst_6 [1] : vector<8x256xf32> to vector<8xf32>
    %54 = vector.shape_cast %53 : vector<8xf32> to vector<8x1xf32>
    %55 = arith.addf %52, %54 : vector<8x1xf32>
    %cst_7 = arith.constant 5.120000e+02 : f32
    %56 = vector.broadcast %cst_7 : f32 to vector<8x1xf32>
    %57 = arith.divf %55, %56 : vector<8x1xf32>
    %cst_8 = arith.constant 0.000000e+00 : f32
    %58 = vector.broadcast %cst_8 : f32 to vector<8x1xf32>
    %59 = vector.broadcast %57 : vector<8x1xf32> to vector<8x256xf32>
    %60 = arith.subf %25, %59 : vector<8x256xf32>
    %61 = arith.mulf %60, %60 : vector<8x256xf32>
    %cst_9 = arith.constant dense<0.000000e+00> : vector<8xf32>
    %62 = vector.multi_reduction <add>, %61, %cst_9 [1] : vector<8x256xf32> to vector<8xf32>
    %63 = vector.shape_cast %62 : vector<8xf32> to vector<8x1xf32>
    %64 = arith.addf %58, %63 : vector<8x1xf32>
    %65 = vector.broadcast %57 : vector<8x1xf32> to vector<8x256xf32>
    %66 = arith.subf %50, %65 : vector<8x256xf32>
    %67 = arith.mulf %66, %66 : vector<8x256xf32>
    %cst_10 = arith.constant dense<0.000000e+00> : vector<8xf32>
    %68 = vector.multi_reduction <add>, %67, %cst_10 [1] : vector<8x256xf32> to vector<8xf32>
    %69 = vector.shape_cast %68 : vector<8xf32> to vector<8x1xf32>
    %70 = arith.addf %64, %69 : vector<8x1xf32>
    %cst_11 = arith.constant 5.120000e+02 : f32
    %71 = vector.broadcast %cst_11 : f32 to vector<8x1xf32>
    %72 = arith.divf %70, %71 : vector<8x1xf32>
    %c0_12 = arith.constant 0 : index
    %c0_13 = arith.constant 0 : index
    %73 = vector.load %arg3[%c0_12, %c0_13] : memref<8x1xf32, #tpu.memory_space<vmem>>, vector<8x1xf32>
    %cst_14 = arith.constant 9.99999974E-6 : f32
    %74 = vector.broadcast %cst_14 : f32 to vector<8x1xf32>
    %75 = arith.addf %72, %74 : vector<8x1xf32>
    %76 = math.rsqrt %75 : vector<8x1xf32>
    %77 = arith.mulf %73, %76 : vector<8x1xf32>
    %c0_15 = arith.constant 0 : index
    %c0_16 = arith.constant 0 : index
    %78 = vector.load %arg4[%c0_15, %c0_16] : memref<8x1xf32, #tpu.memory_space<vmem>>, vector<8x1xf32>
    %79 = arith.mulf %57, %77 : vector<8x1xf32>
    %80 = arith.subf %78, %79 : vector<8x1xf32>
    %81 = vector.broadcast %77 : vector<8x1xf32> to vector<8x256xf32>
    %82 = arith.mulf %25, %81 : vector<8x256xf32>
    %83 = vector.broadcast %80 : vector<8x1xf32> to vector<8x256xf32>
    %84 = arith.addf %82, %83 : vector<8x256xf32>
    %c0_17 = arith.constant 0 : index
    %c0_18 = arith.constant 0 : index
    %c0_19 = arith.constant 0 : index
    %85 = vector.load %arg5[%c0_17, %c0_18, %c0_19] : memref<2x8x256xf32, #tpu.memory_space<vmem>>, vector<1x8x256xf32>
    %86 = vector.shape_cast %85 : vector<1x8x256xf32> to vector<8x256xf32>
    %87 = vector.shape_cast %84 : vector<8x256xf32> to vector<1x8x256xf32>
    tpu.vector_store %arg5[%c0_17, %c0_18, %c0_19], %87 {strides = array<i32>} : memref<2x8x256xf32, #tpu.memory_space<vmem>>, vector<1x8x256xf32>,
    %88 = vector.broadcast %77 : vector<8x1xf32> to vector<8x256xf32>
    %89 = arith.mulf %50, %88 : vector<8x256xf32>
    %90 = vector.broadcast %80 : vector<8x1xf32> to vector<8x256xf32>
    %91 = arith.addf %89, %90 : vector<8x256xf32>
    %c1_20 = arith.constant 1 : index
    %c0_21 = arith.constant 0 : index
    %c0_22 = arith.constant 0 : index
    %92 = vector.load %arg5[%c1_20, %c0_21, %c0_22] : memref<2x8x256xf32, #tpu.memory_space<vmem>>, vector<1x8x256xf32>
    %93 = vector.shape_cast %92 : vector<1x8x256xf32> to vector<8x256xf32>
    %94 = vector.shape_cast %91 : vector<8x256xf32> to vector<1x8x256xf32>
    tpu.vector_store %arg5[%c1_20, %c0_21, %c0_22], %94 {strides = array<i32>} : memref<2x8x256xf32, #tpu.memory_space<vmem>>, vector<1x8x256xf32>,
    return
  }
  func.func @transform_0(%arg0: i32) -> (i32, i32, i32) {
    %c0_i32 = arith.constant 0 : i32
    %c0_i32_0 = arith.constant 0 : i32
    %c0_i32_1 = arith.constant 0 : i32
    %c0_i32_2 = arith.constant 0 : i32
    return %c0_i32, %c0_i32_0, %c0_i32_1 : i32, i32, i32
  }
  func.func @transform_1(%arg0: i32) -> (i32, i32) {
    %c0_i32 = arith.constant 0 : i32
    %c0_i32_0 = arith.constant 0 : i32
    %c0_i32_1 = arith.constant 0 : i32
    return %c0_i32, %c0_i32_0 : i32, i32
  }
  func.func @transform_2(%arg0: i32) -> (i32, i32) {
    %c0_i32 = arith.constant 0 : i32
    %c0_i32_0 = arith.constant 0 : i32
    %c0_i32_1 = arith.constant 0 : i32
    return %c0_i32, %c0_i32_0 : i32, i32
  }
  func.func @transform_3(%arg0: i32) -> (i32, i32) {
    %c0_i32 = arith.constant 0 : i32
    %c0_i32_0 = arith.constant 0 : i32
    %c0_i32_1 = arith.constant 0 : i32
    return %c0_i32, %c0_i32_0 : i32, i32
  }
  func.func @transform_4(%arg0: i32) -> (i32, i32, i32) {
    %c0_i32 = arith.constant 0 : i32
    %c0_i32_0 = arith.constant 0 : i32
    %c0_i32_1 = arith.constant 0 : i32
    %c0_i32_2 = arith.constant 0 : i32
    return %c0_i32, %c0_i32_0, %c0_i32_1 : i32, i32, i32
  }
}

</mosaic_0001>

<bundles_post_ra>
// kernel: tpu_custom_call.1
= control target key start
LH: loop header
LB: loop body
LE: loop exit
PB: predicated region body
PF: predicated region fallthrough
CT: control target
= control target key end

     0   :  { %v251_v1 = vmov 0   ;;  %v252_v2 = vmov 2   ;;  %s302_s0 = inlined_call_operand.vmem [shape: f32[2,4,256], index: 0, kind: input, shape index: {}]   ;;  %s303_s1 = inlined_call_operand.vmem [shape: f32[8,4], index: 1, kind: input, shape index: {}]   ;;  %s304_s2 = inlined_call_operand.vmem [shape: f32[8,1], index: 2, kind: input, shape index: {}]   ;;  %s305_s3 = inlined_call_operand.vmem [shape: f32[8,1], index: 3, kind: input, shape index: {}]   ;;  %s306_s4 = inlined_call_operand.hbm [shape: f32[2,8,256], index: 4, kind: output, shape index: {}]  }
   0x1   :  { %v18_v0 = vld [vmem:[%s303_s1] sm:$0xff]  ;;  %215 = vset.pattern.permute.xlu0 %v251_v1  ;;  %217 = vset.pattern.permute.xlu1 %v252_v2 }
   0x2   :  { %9 = vsyncpa [#allocation3], 0  ;;  %22 = vperm.xlu0 %215, %v18_v0   ;;  %49 = vperm.xlu1 %217, %v18_v0   ;;  %v253_v3 = vmov 1   ;;  %v254_v4 = vmov 3   ;;  %v19_v5 = vld [vmem:[%s302_s0] sm:$0xff]  ;;  %v206_v6 = vld [vmem:[%s302_s0 + $0x8] sm:$0xff] }
   0x3   :  { %220 = vset.pattern.permute.xlu2 %v251_v1  ;;  %v26_v9 = vperm.slane %v19_v5, 0  ;;  %v27_v10 = vperm.slane %v19_v5, 4  ;;  %v38_v11 = vperm.slane %v19_v5, 1  ;;  %v39_v12 = vperm.slane %v19_v5, 5  ;;  %s256_s23 = smov [#allocation2]   ;;  %s194_s26 = sshll.u32 %s306_s4, 4  ;;  %s195_s26 = int_to_ptr.hbm [resolvable:$true] %s194_s26 }
   0x4   :  { %v87_v13 = vperm.slane %v206_v6, 1  ;;  %v88_v14 = vperm.slane %v206_v6, 5  ;;  %v79_v15 = vperm.slane %v206_v6, 0  ;;  %v80_v16 = vperm.slane %v206_v6, 4  ;;  %s258_s27 = smov 16  }
   0x5   :  { %v52_v17 = vperm.slane %v19_v5, 2  ;;  %v53_v18 = vperm.slane %v19_v5, 6  ;;  %v97_v19 = vperm.slane %v206_v6, 2  ;;  %v98_v20 = vperm.slane %v206_v6, 6 }
   0x6   :  { %v66_v21 = vperm.slane %v19_v5, 3  ;;  %v67_v22 = vperm.slane %v19_v5, 7  ;;  %v30_v23 = vperm.slane %v26_v9, 0  ;;  %v31_v24 = vperm.slane %v27_v10, 0 }
   0x7   :  { %v42_v25 = vperm.slane %v38_v11, 1  ;;  %v43_v26 = vperm.slane %v39_v12, 1  ;;  %v91_v27 = vperm.slane %v87_v13, 1  ;;  %v92_v28 = vperm.slane %v88_v14, 1 }
   0x8   :  { %v83_v29 = vperm.slane %v79_v15, 0  ;;  %v84_v30 = vperm.slane %v80_v16, 0  ;;  %v56_v31 = vperm.slane %v52_v17, 2  ;;  %v57_v32 = vperm.slane %v53_v18, 2 }
   0x9   :  { %v101_v33 = vperm.slane %v97_v19, 2  ;;  %v102_v34 = vperm.slane %v98_v20, 2  ;;  %v70_v35 = vperm.slane %v66_v21, 3  ;;  %v71_v36 = vperm.slane %v67_v22, 3 }
   0xa   :  { %216 = vset.pattern.permute.xlu0 %v253_v3  ;;  %218 = vset.pattern.permute.xlu1 %v254_v4  ;;  %v107_v40 = vperm.slane %v206_v6, 3  ;;  %v108_v41 = vperm.slane %v206_v6, 7  ;;  %v255_v10 = vmov 512.0  }
   0xb   :  { %35 = vperm.xlu0 %216, %v18_v0   ;;  %63 = vperm.xlu1 %218, %v18_v0   ;;  %221 = vrcp.f32 %v255_v10 }
   0xc   :  { %v111_v55 = vperm.slane %v107_v40, 3  ;;  %v112_v56 = vperm.slane %v108_v41, 3  ;;  %v149_v40 = vld [vmem:[%s304_s2] sm:$0xff]  ;;  %s192_s2 = sshll.u32 %s256_s23, 4  ;;  %s193_s2 = int_to_ptr.vmem [resolvable:$true] %s192_s2 }
  0x11   :  { %v222_v11 = vpop.eup %221 }
  0x12   :  { %v125_v12 = vmul.f32 512.0, %v222_v11  ;;  %vm129_vm0 = vweird.f32 %v222_v11 }
  0x13   :  { %219 = vset.pattern.permute.xlu0 %v251_v1 }
  0x14   :  { %v126_v13 = vsub.f32 1.0, %v125_v12 }
  0x16   :  { %v127_v15 = vmul.f32 %v222_v11, %v126_v13 }
  0x74   :  { %v23_v7 = vpop.permute.xlu0 %22  ;;  %v50_v8 = vpop.permute.xlu1 %49 }
  0x75   :  { %v32_v37 = vmul.f32 %v30_v23, %v23_v7  ;;  %v33_v38 = vmul.f32 %v31_v24, %v23_v7  ;;  %v85_v47 = vmul.f32 %v83_v29, %v23_v7  ;;  %v86_v48 = vmul.f32 %v84_v30, %v23_v7 }
  0x76   :  { %v58_v49 = vmul.f32 %v56_v31, %v50_v8  ;;  %v59_v50 = vmul.f32 %v57_v32, %v50_v8  ;;  %v103_v61 = vmul.f32 %v101_v33, %v50_v8  ;;  %v104_v62 = vmul.f32 %v102_v34, %v50_v8 }
  0x77   :  { %v128_v8 = vadd.f32 %v222_v11, %v127_v15 }
  0x79   :  { %v130_v16 = vsel %vm129_vm0, %v222_v11, %v128_v8 }
  0x7d   :  { %v36_v39 = vpop.permute.xlu0 %35  ;;  %v64_v42 = vpop.permute.xlu1 %63 }
  0x7e   :  { %v44_v43 = vmul.f32 %v42_v25, %v36_v39  ;;  %v45_v44 = vmul.f32 %v43_v26, %v36_v39  ;;  %v93_v45 = vmul.f32 %v91_v27, %v36_v39  ;;  %v94_v46 = vmul.f32 %v92_v28, %v36_v39 }
  0x7f   :  { %v72_v53 = vmul.f32 %v70_v35, %v64_v42  ;;  %v73_v54 = vmul.f32 %v71_v36, %v64_v42  ;;  %v113_v1 = vmul.f32 %v111_v55, %v64_v42  ;;  %v114_v2 = vmul.f32 %v112_v56, %v64_v42 }
  0x80   :  { %v46_v51 = vadd.f32 %v44_v43, %v32_v37  ;;  %v47_v52 = vadd.f32 %v45_v44, %v33_v38  ;;  %v95_v57 = vadd.f32 %v93_v45, %v85_v47  ;;  %v96_v58 = vadd.f32 %v94_v46, %v86_v48  ;;  %v162_v44 = vld [vmem:[%s305_s3] sm:$0xff]  ;;  %s257_s3 = smov 256  }
  0x82   :  { %v60_v59 = vadd.f32 %v58_v49, %v46_v51  ;;  %v61_v60 = vadd.f32 %v59_v50, %v47_v52  ;;  %v105_v4 = vadd.f32 %v103_v61, %v95_v57  ;;  %v106_v5 = vadd.f32 %v104_v62, %v96_v58 }
  0x84   :  { %v74_v63 = vadd.f32 %v72_v53, %v60_v59  ;;  %v75_v0 = vadd.f32 %v73_v54, %v61_v60  ;;  %v115_v6 = vadd.f32 %v113_v1, %v105_v4  ;;  %v116_v7 = vadd.f32 %v114_v2, %v106_v5 }
  0x86   :  { %v117_v3 = vadd.f32 %v75_v0, %v74_v63  ;;  %v120_v9 = vadd.f32 %v116_v7, %v115_v6 }
  0x88   :  { %118 = vadd.xlane.f32.xlu2 %v117_v3 }
  0x90   :  { %121 = vadd.xlane.f32.xlu2 %v120_v9 }
  0xfb   :  { %v119_v14 = vpop.xlane.xlu2 %118 }
 0x103   :  { %v122_v17 = vpop.xlane.xlu2 %121 }
 0x104   :  { %v123_v18 = vadd.f32 %v122_v17, %v119_v14 }
 0x106   :  { %v131_v19 = vmul.f32 %v130_v16, %v123_v18 }
 0x108   :  { %v140_v20 = vsub.f32 %v115_v6, %v131_v19  ;;  %v141_v21 = vsub.f32 %v116_v7, %v131_v19  ;;  %v132_v22 = vsub.f32 %v74_v63, %v131_v19  ;;  %v133_v23 = vsub.f32 %v75_v0, %v131_v19 }
 0x10a   :  { %v142_v24 = vmul.f32 %v140_v20, %v140_v20  ;;  %v143_v25 = vmul.f32 %v141_v21, %v141_v21  ;;  %v134_v26 = vmul.f32 %v132_v22, %v132_v22  ;;  %v135_v27 = vmul.f32 %v133_v23, %v133_v23 }
 0x10c   :  { %v144_v28 = vadd.f32 %v143_v25, %v142_v24  ;;  %v136_v29 = vadd.f32 %v135_v27, %v134_v26 }
 0x10e   :  { %145 = vadd.xlane.f32.xlu2 %v144_v28  ;;  %137 = vadd.xlane.f32.xlu1 %v136_v29 }
 0x181   :  { %v146_v30 = vpop.xlane.xlu2 %145  ;;  %v138_v31 = vpop.xlane.xlu1 %137 }
 0x182   :  { %v147_v32 = vadd.f32 %v146_v30, %v138_v31 }
 0x184   :  { %v148_v33 = vmul.f32 %v147_v32, %v130_v16 }
 0x186   :  { %v150_v34 = vadd.f32 1e-05, %v148_v33 }
 0x188   :  { %223 = vrsqrt.f32 %v150_v34  ;;  %vm157_vm2 = vweird.f32 %v150_v34 }
 0x18e   :  { %v224_v35 = vpop.eup %223 }
 0x18f   :  { %v152_v36 = vmul.f32 %v224_v35, %v150_v34  ;;  %vm158_vm1 = vweird.f32 %v224_v35 }
 0x190   :  { %vm159_vm3 = vmor %vm157_vm2, %vm158_vm1 }
 0x191   :  { %v153_v37 = vmul.f32 %v224_v35, %v152_v36 }
 0x193   :  { %v154_v38 = vmul.f32 0.5, %v153_v37 }
 0x195   :  { %v155_v39 = vsub.f32 1.5, %v154_v38 }
 0x197   :  { %v156_v41 = vmul.f32 %v224_v35, %v155_v39 }
 0x199   :  { %v160_v42 = vsel %vm159_vm3, %v224_v35, %v156_v41 }
 0x19a   :  { %v161_v43 = vmul.f32 %v160_v42, %v149_v40 }
 0x19c   :  { %167 = vperm.xlu0 %219, %v161_v43   ;;  %v163_v45 = vmul.f32 %v161_v43, %v131_v19 }
 0x19e   :  { %v164_v46 = vsub.f32 %v162_v44, %v163_v45 }
 0x1a0   :  { %174 = vperm.xlu2 %220, %v164_v46  }
 0x1fa   :  { %v175_v52 = vpop.permute.xlu2 %174 }
 0x20e   :  { %v168_v47 = vpop.permute.xlu0 %167 }
 0x20f   :  { %v170_v48 = vmul.f32 %v168_v47, %v74_v63  ;;  %v171_v49 = vmul.f32 %v168_v47, %v75_v0  ;;  %v181_v50 = vmul.f32 %v168_v47, %v115_v6  ;;  %v182_v51 = vmul.f32 %v168_v47, %v116_v7 }
 0x211   :  { %v177_v53 = vadd.f32 %v175_v52, %v170_v48  ;;  %v178_v54 = vadd.f32 %v175_v52, %v171_v49  ;;  %v183_v55 = vadd.f32 %v181_v50, %v175_v52  ;;  %v184_v56 = vadd.f32 %v182_v51, %v175_v52 }
 0x213   :  { %179 = vst [vmem:[#allocation2] sm:$0xff] %v177_v53 }
 0x214   :  { %180 = vst [vmem:[#allocation2 + $0x8] sm:$0xff] %v178_v54 }
 0x215   :  { %186 = vst [vmem:[#allocation2 + $0x10] sm:$0xff] %v183_v55 }
 0x216   :  { %187 = vst [vmem:[#allocation2 + $0x18] sm:$0xff] %v184_v56 }
 0x217   :  { %200 = dma.vmem_to_hbm [thread:$0]  %s193_s2, 512, %s195_s26, [#allocation3], %s257_s3, %s257_s3, %s258_s27  }
 0x218   :  { %249 = dma.done.wait [#allocation3], 512  }
 0x219   :  { %250 = vsyncadd [#allocation3], 4294966784 }
 0x21a   :  { %205 = vsyncpa [#allocation3], 1 }

</bundles_post_ra>
